<compile_context>
chip_gen: v5e
topology: v5e:2x2
jax: 0.10.0
libtpu: 0.0.40
codegen_flags: <defaults>
</compile_context>

<pallas_src>
import jax
import jax.numpy as jnp
from jax.experimental import pallas as pl
from jax.experimental.pallas import tpu as pltpu


def transition_kernel(x_ref, scale_ref, bias_ref, w_ref, pool_ref, o_ref):
    # x_ref:     (1, Cin, ts)   input spatial tile (bf16 or f32)
    # scale_ref: (Cin, 1)  f32  folded BN scale  (gamma / sqrt(var+eps))
    # bias_ref:  (Cin, 1)  f32  folded BN bias   (beta - mean*scale)
    # w_ref:     (Cout, Cin) bf16  1x1-conv weight
    # pool_ref:  (ts, to)  bf16  2x2 average-pool matrix (entries 0.25)
    # o_ref:     (1, Cout, to) f32 output spatial tile
    x = x_ref[0].astype(jnp.float32)                                 # (Cin, ts)
    z = jnp.maximum(x * scale_ref[...] + bias_ref[...], 0.0)         # BN + ReLU
    y = jnp.dot(w_ref[...], z.astype(w_ref.dtype),
                preferred_element_type=jnp.float32)                  # (Cout, ts)
    o_ref[0] = jnp.dot(y.astype(pool_ref.dtype), pool_ref[...],
                       preferred_element_type=jnp.float32
                       ).astype(o_ref.dtype)                         # (Cout, to)


def _choose_rows_per_tile(Ho, W, max_tile_elems):
    """Output rows per spatial tile. ts = rp*2*W input elements per tile."""
    full = 2 * Ho * W                      # whole image (always legal)
    if full <= max_tile_elems:
        return Ho
    for rp in range(Ho - 1, 0, -1):        # largest divisor of Ho whose tile
        if Ho % rp:                        # keeps input lanes %128==0 and
            continue                       # output lanes (ts/4) %128==0.
        ts = rp * 2 * W
        if ts <= max_tile_elems and ts % 512 == 0:
            return rp
    return Ho                              # fallback: whole image per step


def transition_forward(x_nchw, gamma, beta, run_mean, run_var, conv_w,
                       eps=1e-5, max_tile_elems=4096):
    """x_nchw: (N, Cin, H, W) any float dtype (bf16 preferred);
    conv_w: (Cout, Cin, 1, 1).  Returns NCHW (N, Cout, H//2, W//2) in f32."""
    N, Cin, H, W = x_nchw.shape
    Cout = conv_w.shape[0]
    assert H % 2 == 0 and W % 2 == 0, "avg_pool2d(2) path expects even H, W"
    Ho, Wo = H // 2, W // 2
    S = H * W

    # Fold BN (inference mode) into per-channel scale/bias, kept in f32.
    scale = (gamma / jnp.sqrt(run_var + eps)).astype(jnp.float32)
    bias = (beta - run_mean * scale).astype(jnp.float32)
    scale2d = scale.reshape(Cin, 1)
    bias2d = bias.reshape(Cin, 1)

    # 1x1 conv weight as a (Cout, Cin) bf16 matmul operand (MXU-native).
    w2d = conv_w[:, :, 0, 0].astype(jnp.bfloat16)

    # Spatial tiling: rp output rows (= 2*rp input rows) per grid step.
    rp = _choose_rows_per_tile(Ho, W, max_tile_elems)
    ts = rp * 2 * W          # input spatial elements per tile
    to = rp * Wo             # output spatial elements per tile
    n_sp = Ho // rp

    # 2x2 average pool expressed as a (ts, to) matmul over the flattened
    # spatial (lane) dim.  0.25 is folded in here.  Translation-invariant in
    # units of row-pairs, so one matrix serves every tile.
    r = jnp.arange(ts) // W
    c = jnp.arange(ts) % W
    ho = jnp.arange(to) // Wo
    wo = jnp.arange(to) % Wo
    pool = ((((r[:, None] // 2) == ho[None, :]) &
             ((c[:, None] // 2) == wo[None, :]))
            .astype(jnp.bfloat16) * jnp.bfloat16(0.25))

    # Pure reshape (no data movement): NCHW with flattened spatial as lanes.
    x_flat = x_nchw.reshape(N, Cin, S)

    in_itemsize = jnp.dtype(x_nchw.dtype).itemsize
    vmem_est = (2 * Cin * ts * in_itemsize        # double-buffered input tiles
                + 2 * Cout * to * 4               # double-buffered output tiles
                + ts * to * 2                     # resident pool matrix
                + Cout * Cin * 2 + Cin * 8        # weight + scale/bias
                + 2 * (Cin + Cout) * ts * 4)      # f32/bf16 working values
    vmem_limit = int(min(max(2 * vmem_est, 32 * 1024 * 1024),
                         60 * 1024 * 1024))       # stay under v7x's 64 MiB

    out = pl.pallas_call(
        transition_kernel,
        out_shape=jax.ShapeDtypeStruct((N, Cout, Ho * Wo), jnp.float32),
        grid_spec=pltpu.PrefetchScalarGridSpec(
            num_scalar_prefetch=0,
            grid=(N, n_sp),
            in_specs=[
                pl.BlockSpec((1, Cin, ts), lambda n, t: (n, 0, t)),
                pl.BlockSpec((Cin, 1), lambda n, t: (0, 0)),
                pl.BlockSpec((Cin, 1), lambda n, t: (0, 0)),
                pl.BlockSpec((Cout, Cin), lambda n, t: (0, 0)),
                pl.BlockSpec((ts, to), lambda n, t: (0, 0)),
            ],
            out_specs=pl.BlockSpec((1, Cout, to), lambda n, t: (n, 0, t)),
        ),
        compiler_params=pltpu.CompilerParams(
            dimension_semantics=("parallel", "parallel"),
            vmem_limit_bytes=vmem_limit),
    )(x_flat, scale2d, bias2d, w2d, pool)

    # (N, Cout, Ho*Wo) -> NCHW, pure reshape.
    return out.reshape(N, Cout, Ho, Wo)


def reference_forward(x, gamma, beta, run_mean, run_var, conv_w, eps=1e-5):
    # Pure-JAX f32 reference mirroring the PyTorch forward (eval-mode BN).
    xn = (x - run_mean[None, :, None, None]) / jnp.sqrt(
        run_var + eps)[None, :, None, None]
    z = jnp.maximum(xn * gamma[None, :, None, None] + beta[None, :, None, None], 0.0)
    conv = jnp.einsum("oi,nihw->nohw", conv_w[:, :, 0, 0], z)
    N, Co, H, W = conv.shape
    pooled = conv.reshape(N, Co, H // 2, 2, W // 2, 2).mean(axis=(3, 5))
    return pooled


if __name__ == "__main__":
    key = jax.random.PRNGKey(0)
    in_planes, out_planes = 4, 8
    N, H, W = 2, 16, 16

    ks = jax.random.split(key, 6)
    x = jax.random.normal(ks[0], (N, in_planes, H, W), dtype=jnp.float32)
    gamma = jax.random.normal(ks[1], (in_planes,), dtype=jnp.float32) * 0.1 + 1.0
    beta = jax.random.normal(ks[2], (in_planes,), dtype=jnp.float32) * 0.1
    run_mean = jax.random.normal(ks[3], (in_planes,), dtype=jnp.float32) * 0.1
    run_var = jax.nn.softplus(jax.random.normal(ks[4], (in_planes,),
                                                dtype=jnp.float32)) + 0.5
    conv_w = jax.random.normal(ks[5], (out_planes, in_planes, 1, 1),
                               dtype=jnp.float32) * 0.2

    # Feed activations as bf16 (halves kernel HBM traffic; bf16 MXU matmuls).
    x_bf16 = x.astype(jnp.bfloat16)

    out = transition_forward(x_bf16, gamma, beta, run_mean, run_var, conv_w)
    out = jax.block_until_ready(out)

    # Reference computed in f32 from the same bf16-rounded input, so the only
    # kernel-vs-ref delta is the bf16 matmul rounding (~1% relative).
    ref = reference_forward(x_bf16.astype(jnp.float32), gamma, beta,
                            run_mean, run_var, conv_w)
    assert out.shape == (N, out_planes, H // 2, W // 2)
    assert jnp.allclose(out, ref, atol=5e-2, rtol=5e-2), (
        "mismatch vs reference, max abs diff = "
        + str(float(jnp.max(jnp.abs(out - ref)))))

    # TODO(synk): training-mode BatchNorm (batch statistics) not implemented;
    # inference-mode (running stats) semantics are used.
    print("KERNEL_OK")
</pallas_src>

<mosaic_0001>
module attributes {stable_mosaic.version = 11 : i64} {
  func.func @transition_kernel(%arg0: i32, %arg1: i32, %arg2: memref<1x4x256xbf16, #tpu.memory_space<vmem>>, %arg3: memref<4x1xf32, #tpu.memory_space<vmem>>, %arg4: memref<4x1xf32, #tpu.memory_space<vmem>>, %arg5: memref<8x4xbf16, #tpu.memory_space<vmem>>, %arg6: memref<256x64xbf16, #tpu.memory_space<vmem>>, %arg7: memref<1x8x64xf32, #tpu.memory_space<vmem>>) attributes {dimension_semantics = [#tpu.dimension_semantics<parallel>, #tpu.dimension_semantics<parallel>], iteration_bounds = array<i64: 2, 1>, scalar_prefetch = 0 : i64, scratch_operands = 0 : i64, tpu.core_type = #tpu.core_type<tc>, window_params = [{transform_indices = @transform_0, window_bounds = array<i64: 1, 4, 256>}, {pipeline_mode = #tpu.pipeline_mode<synchronous>, transform_indices = @transform_1, window_bounds = array<i64: 4, 1>}, {pipeline_mode = #tpu.pipeline_mode<synchronous>, transform_indices = @transform_2, window_bounds = array<i64: 4, 1>}, {pipeline_mode = #tpu.pipeline_mode<synchronous>, transform_indices = @transform_3, window_bounds = array<i64: 8, 4>}, {pipeline_mode = #tpu.pipeline_mode<synchronous>, transform_indices = @transform_4, window_bounds = array<i64: 256, 64>}, {transform_indices = @transform_5, window_bounds = array<i64: 1, 8, 64>}]} {
    %c0 = arith.constant 0 : index
    %c0_0 = arith.constant 0 : index
    %c0_1 = arith.constant 0 : index
    %0 = vector.load %arg2[%c0, %c0_0, %c0_1] : memref<1x4x256xbf16, #tpu.memory_space<vmem>>, vector<1x4x256xbf16>
    %1 = vector.shape_cast %0 : vector<1x4x256xbf16> to vector<4x256xbf16>
    %2 = arith.extf %1 : vector<4x256xbf16> to vector<4x256xf32>
    %c0_2 = arith.constant 0 : index
    %c0_3 = arith.constant 0 : index
    %3 = vector.load %arg3[%c0_2, %c0_3] : memref<4x1xf32, #tpu.memory_space<vmem>>, vector<4x1xf32>
    %4 = vector.broadcast %3 : vector<4x1xf32> to vector<4x256xf32>
    %5 = arith.mulf %2, %4 : vector<4x256xf32>
    %c0_4 = arith.constant 0 : index
    %c0_5 = arith.constant 0 : index
    %6 = vector.load %arg4[%c0_4, %c0_5] : memref<4x1xf32, #tpu.memory_space<vmem>>, vector<4x1xf32>
    %7 = vector.broadcast %6 : vector<4x1xf32> to vector<4x256xf32>
    %8 = arith.addf %5, %7 : vector<4x256xf32>
    %cst = arith.constant 0.000000e+00 : f32
    %9 = vector.broadcast %cst : f32 to vector<4x256xf32>
    %10 = arith.maximumf %8, %9 : vector<4x256xf32>
    %c0_6 = arith.constant 0 : index
    %c0_7 = arith.constant 0 : index
    %11 = vector.load %arg5[%c0_6, %c0_7] : memref<8x4xbf16, #tpu.memory_space<vmem>>, vector<8x4xbf16>
    %12 = arith.truncf %10 : vector<4x256xf32> to vector<4x256xbf16>
    %cst_8 = arith.constant dense<0.000000e+00> : vector<8x256xf32>
    %13 = tpu.matmul %11, %12, %cst_8 {dimension_numbers = #tpu.dot_dimension_numbers<[1], [0], [0], [1], [0, 0, 1, 1], [], []>} : vector<8x4xbf16>, vector<4x256xbf16>, vector<8x256xf32> -> vector<8x256xf32>
    %14 = arith.truncf %13 : vector<8x256xf32> to vector<8x256xbf16>
    %c0_9 = arith.constant 0 : index
    %c0_10 = arith.constant 0 : index
    %15 = vector.load %arg6[%c0_9, %c0_10] : memref<256x64xbf16, #tpu.memory_space<vmem>>, vector<256x64xbf16>
    %cst_11 = arith.constant dense<0.000000e+00> : vector<8x64xf32>
    %16 = tpu.matmul %14, %15, %cst_11 {dimension_numbers = #tpu.dot_dimension_numbers<[1], [0], [0], [1], [0, 0, 1, 1], [], []>} : vector<8x256xbf16>, vector<256x64xbf16>, vector<8x64xf32> -> vector<8x64xf32>
    %c0_12 = arith.constant 0 : index
    %c0_13 = arith.constant 0 : index
    %c0_14 = arith.constant 0 : index
    %17 = vector.load %arg7[%c0_12, %c0_13, %c0_14] : memref<1x8x64xf32, #tpu.memory_space<vmem>>, vector<1x8x64xf32>
    %18 = vector.shape_cast %17 : vector<1x8x64xf32> to vector<8x64xf32>
    %19 = vector.shape_cast %16 : vector<8x64xf32> to vector<1x8x64xf32>
    tpu.vector_store %arg7[%c0_12, %c0_13, %c0_14], %19 {strides = array<i32>} : memref<1x8x64xf32, #tpu.memory_space<vmem>>, vector<1x8x64xf32>,
    return
  }
  func.func @transform_0(%arg0: i32, %arg1: i32) -> (i32, i32, i32) {
    %c0_i32 = arith.constant 0 : i32
    %c0_i32_0 = arith.constant 0 : i32
    return %arg0, %c0_i32, %arg1 : i32, i32, i32
  }
  func.func @transform_1(%arg0: i32, %arg1: i32) -> (i32, i32) {
    %c0_i32 = arith.constant 0 : i32
    %c0_i32_0 = arith.constant 0 : i32
    %c0_i32_1 = arith.constant 0 : i32
    return %c0_i32, %c0_i32_0 : i32, i32
  }
  func.func @transform_2(%arg0: i32, %arg1: i32) -> (i32, i32) {
    %c0_i32 = arith.constant 0 : i32
    %c0_i32_0 = arith.constant 0 : i32
    %c0_i32_1 = arith.constant 0 : i32
    return %c0_i32, %c0_i32_0 : i32, i32
  }
  func.func @transform_3(%arg0: i32, %arg1: i32) -> (i32, i32) {
    %c0_i32 = arith.constant 0 : i32
    %c0_i32_0 = arith.constant 0 : i32
    %c0_i32_1 = arith.constant 0 : i32
    return %c0_i32, %c0_i32_0 : i32, i32
  }
  func.func @transform_4(%arg0: i32, %arg1: i32) -> (i32, i32) {
    %c0_i32 = arith.constant 0 : i32
    %c0_i32_0 = arith.constant 0 : i32
    %c0_i32_1 = arith.constant 0 : i32
    return %c0_i32, %c0_i32_0 : i32, i32
  }
  func.func @transform_5(%arg0: i32, %arg1: i32) -> (i32, i32, i32) {
    %c0_i32 = arith.constant 0 : i32
    %c0_i32_0 = arith.constant 0 : i32
    return %arg0, %c0_i32, %arg1 : i32, i32, i32
  }
}

</mosaic_0001>

<bundles_post_ra>
// kernel: tpu_custom_call.1
= control target key start
LH: loop header
LB: loop body
LE: loop exit
PB: predicated region body
PF: predicated region fallthrough
CT: control target
= control target key end

     0   :  { %10 = vsyncpa [#allocation3], 0  ;;  %s993_s0 = inlined_call_operand.vmem [shape: bf16[2,4,256], index: 0, kind: input, shape index: {}]   ;;  %s994_s1 = inlined_call_operand.vmem [shape: f32[4,1], index: 1, kind: input, shape index: {}]   ;;  %s995_s2 = inlined_call_operand.vmem [shape: f32[4,1], index: 2, kind: input, shape index: {}]   ;;  %s996_s3 = inlined_call_operand.vmem [shape: bf16[8,4], index: 3, kind: input, shape index: {}]   ;;  %s997_s4 = inlined_call_operand.vmem [shape: bf16[256,64], index: 4, kind: input, shape index: {}]   ;;  %s998_s5 = inlined_call_operand.hbm [shape: f32[2,8,64], index: 5, kind: output, shape index: {}]  }
   0x1   :  { %12 = vsyncpa [#allocation3 + $0x1], 0  ;;  %s839_s18 = smov 0   ;;  %s841_s19 = smov 0  }
   0x2   :  { %s843_s20 = smov 0   ;;  %s845_s21 = smov 0  }
   0x3   :  { %s847_s22 = smov 0   ;;  %s849_s23 = smov 0  }
   0x4 LB: > { %s574_s24 = sadd.s32 4294967295, %s805_s23   ;;  %s575_s25 = sadd.s32 4294967294, %s805_s23   ;;  %s805_s23 = sphi %s849_s23, %s18_s23   ;;  %s801_s22 = sphi %s847_s22, %s1005_s22   ;;  %s797_s21 = sphi %s845_s21, %s1004_s21   ;;  %s793_s20 = sphi %s843_s20, %s1003_s20   ;;  %s789_s19 = sphi %s841_s19, %s1002_s19   ;;  %s785_s18 = sphi %s839_s18, %s1001_s18  }
   0x5   : > { %s30_s26 = sadd.s32 1, %s801_s22  ;;  %s151_s27 = sadd.s32 1, %s793_s20 }
   0x6   : > { %p32_p0 = scmp.ge.s32.totalorder %s30_s26, 2  ;;  %p161_p1 = scmp.ne.s32.totalorder %s793_s20, %s789_s19 }
   0x7   : > { %p162_p2 = scmp.eq.s32.totalorder %s574_s24, 1  ;;  %p167_p3 = scmp.ne.s32.totalorder %s789_s19, %s785_s18 }
   0x8   : > { %s1007_s26 = smov (%p32_p0, %s30_s26), 0  ;;  %p168_p5 = scmp.eq.s32.totalorder %s575_s25, 1 }
   0x9   : > { %p879_p4 = por %p162_p2, %p161_p1  ;;  %s146_s29 = ssub.s32 %s801_s22, %s1007_s26 }
   0xa   : > { %p578_p6 = scmp.ge.s32.totalorder %s805_s23, 1  ;;  %p149_p7 = scmp.eq.s32.totalorder %s146_s29, 0 }
   0xb   : > { %p886_p8 = por %p168_p5, %p167_p3  ;;  %p211_p9 = scmp.lt.s32.totalorder %s805_s23, 3 }
   0xc   : > { %s892_s6 = scalar_select %p149_p7, %s793_s20, %s151_s27  }
   0xd   : > { %p212_p10 = pnand %p578_p6, %p211_p9 }
   0xe   : > { %p244_p11 = scmp.lt.s32.totalorder (!%p212_p10), %s797_s21, 1  ;;  %s240_s27 = sand.u32 (!%p212_p10), 1, %s789_s19  }
   0xf   : > { %215 = sbr.rel (%p212_p10) target bundleno = 433 (0x1b1), region = 40  ;;  %s649_s29 = sshll.u32 (!%p212_p10), %s797_s21, 3 }
  0x10   : > { %s579_s7 = sshll.u32 (!%p212_p10), %s240_s27, 3  ;;  %s495_s10 = scalar_lea.hbm (!%p212_p10), %s998_s5, %s649_s29 }
  0x11   : > { %s499_s13 = sshll.u32 (!%p212_p10), %s495_s10, 4  ;;  %s484_s14 = scalar_lea.sflag (!%p212_p10), [#allocation3], %s240_s27  ;;  %s500_s13 = int_to_ptr.hbm [resolvable:$true] %s499_s13 }
  0x12   : > { %s741_s15 = sshra.s32 (!%p212_p10), %s500_s13, 4  ;;  %s747_s24 = scalar_lea.hbm (!%p212_p10), %s998_s5, 16  ;;  %s742_s15 = int_to_ptr.hbm [resolvable:$true] %s741_s15 }
  0x13   : > { %p748_p1 = scmp.lt.s32.totalorder (!%p212_p10), %s742_s15, %s998_s5 }
  0x14   : > { %v256_v0 = vld [vmem:[%s994_s1] sm:$0xf]  ;;  %v807_v1 = vmov 0   ;;  %s245_s11 = scalar_select %p244_p11, %s797_s21, 1  ;;  %v808_v3 = vmov 839922192  }
  0x15   : > { %726 = vset.pattern.permute.xlu0 %v807_v1  ;;  %v267_v2 = vld [vmem:[%s995_s2] sm:$0xf]  ;;  %v262_v4 = vunpack.c.l.s4 %v808_v3  ;;  %v660_v5 = vld [vmem:[%s997_s4 + $0x38] sm:$0xff]  ;;  %v659_v7 = vld [vmem:[%s997_s4 + $0x30] sm:$0xff]  ;;  %vm292_vm0 = vcmask 1041408   ;;  %vm288_vm1 = vcmask 31744  }
  0x16   : > { %259 = vperm.xlu0 %726, %v256_v0   ;;  %s652_s12 = sshll.u32 %s245_s11, 2  ;;  %v668_v6 = vld [vmem:[%s997_s4 + $0x78] sm:$0xff]  ;;  %455 = vmatpush.bf16.msra.mxu2 %v660_v5  ;;  %v667_v8 = vld [vmem:[%s997_s4 + $0x70] sm:$0xff]  ;;  %v658_v12 = vld [vmem:[%s997_s4 + $0x28] sm:$0xff]  ;;  %s242_s11 = scalar_lea.vmem [#allocation2], %s579_s7  ;;  %vm481_vm2 = vcmask 523264  }
  0x17   : > { %s251_s25 = scalar_lea.vmem %s993_s0, %s652_s12  ;;  %468 = vmatpush.bf16.msra.mxu3 %v668_v6  ;;  %v263_v10 = vunpack.c.0.s8 %v262_v4  ;;  %v666_v13 = vld [vmem:[%s997_s4 + $0x68] sm:$0xff]  ;;  %v657_v16 = vld [vmem:[%s997_s4 + $0x20] sm:$0xff]  ;;  %v656_v22 = vld [vmem:[%s997_s4 + $0x18] sm:$0xff]  ;;  %s497_s12 = sshll.u32 %s242_s11, 4  ;;  %s498_s12 = int_to_ptr.vmem [resolvable:$true] %s497_s12 }
  0x18   : > { %v254_v11 = vld [vmem:[%s251_s25] sm:$0xf]  ;;  %v664_v23 = vld [vmem:[%s997_s4 + $0x58] sm:$0xff]  ;;  %v655_v25 = vld [vmem:[%s997_s4 + $0x10] sm:$0xff]  ;;  %s743_s21 = scalar_lea.hbm %s742_s15, 8 }
  0x19   : > { %v255_v14 = vunpack.c.l.bf16 %v254_v11  ;;  %v665_v17 = vld [vmem:[%s997_s4 + $0x60] sm:$0xff]  ;;  %v663_v26 = vld [vmem:[%s997_s4 + $0x50] sm:$0xff]  ;;  %v654_v27 = vld [vmem:[%s997_s4 + $0x8] sm:$0xff]  ;;  %p744_p12 = scmp.ne.s32.totalorder %s742_s15, %s743_s21  ;;  %p749_p2 = scmp.lt.s32.totalorder %s747_s24, %s743_s21 }
  0x1a   : > { %456 = vmatpush.bf16.msra.mxu2 %v659_v7  ;;  %v662_v28 = vld [vmem:[%s997_s4 + $0x48] sm:$0xff]  ;;  %v279_v35 = vld [vmem:[%s996_s3] sm:$0xf] }
  0x1b   : > { %469 = vmatpush.bf16.msra.mxu3 %v667_v8  ;;  %v653_v36 = vld [vmem:[%s997_s4] sm:$0xff]  ;;  %p745_p13 = pnand %p744_p12, %p879_p4  ;;  %p750_p3 = por %p749_p2, %p748_p1 }
  0x1c   : > { %v661_v37 = vld [vmem:[%s997_s4 + $0x40] sm:$0xff] }
  0x1d   : > { %p746_p0 = pneg %p745_p13 }
  0x1e   : > { %270 = vperm.xlu0 %726, %v267_v2   ;;  %457 = vmatpush.bf16.msra.mxu2 %v658_v12 }
  0x1f   : > { %470 = vmatpush.bf16.msra.mxu3 %v666_v13  ;;  %p751_p5 = pnand %p750_p3, %p746_p0 }
  0x22   : > { %458 = vmatpush.bf16.msra.mxu2 %v657_v16 }
  0x23   : > { %471 = vmatpush.bf16.msra.mxu3 %v665_v17 }
  0x26   : > { %459 = vmatpush.bf16.msra.mxu2 %v656_v22 }
  0x27   : > { %472 = vmatpush.bf16.msra.mxu3 %v664_v23 }
  0x2a   : > { %460 = vmatpush.bf16.msra.mxu2 %v655_v25 }
  0x2b   : > { %473 = vmatpush.bf16.msra.mxu3 %v663_v26 }
  0x2e   : > { %461 = vmatpush.bf16.msra.mxu2 %v654_v27 }
  0x2f   : > { %474 = vmatpush.bf16.msra.mxu3 %v662_v28 }
  0x32   : > { %462 = vmatpush.bf16.msra.mxu2 %v653_v36 }
  0x33   : > { %475 = vmatpush.bf16.msra.mxu3 %v661_v37 }
  0x88   : > { %v260_v9 = vpop.permute.xlu0 %259 }
  0x89   : > { %v264_v15 = vperm.slane %v260_v9, %v263_v10 }
  0x8b   : > { %v266_v19 = vmul.f32 %v264_v15, %v255_v14 }
  0x90   : > { %v271_v18 = vpop.permute.xlu0 %270 }
  0x91   : > { %v275_v20 = vperm.slane %v271_v18, %v263_v10 }
  0x93   : > { %v277_v21 = vadd.f32 %v275_v20, %v266_v19 }
  0x95   : > { %v278_v24 = vmax.f32 %v277_v21, 0.0 }
  0x97   : > { %281 = vst [vmem:[#allocation1] ss:$2 sm:$0xff] %v278_v24 }
  0x9e   : > { %v282_v29 = vld.sshfl [vmem:[#allocation1] sm:$0xff pattern:$0x75316420]  ;;  %v283_v30 = vld.sshfl [vmem:[#allocation1 + $0x8] sm:$0xff pattern:$0x75316420] }
  0x9f   : > { %v286_v31 = vpack.c.bf16 %v282_v29, %v282_v29  ;;  %v287_v32 = vpack.c.bf16 %v283_v30, %v283_v30 }
  0xa1   : > { %v294_v33 = vsel %vm292_vm0, %v286_v31, 0  ;;  %v297_v34 = vsel %vm292_vm0, %v287_v32, 0 }
  0xa2   : > { %306 = vmatpush.bf16.msra.mxu0 %v294_v33  ;;  %319 = vmatpush.bf16.msra.mxu1 %v297_v34 }
  0xa5   : > { %582 = vmatmul.msk.bf16.vlgmr.msra.gmra.mxu0 %vm288_vm1, %v279_v35  ;;  %583 = vmatmul.msk.bf16.vlgmr.msra.gmra.mxu1 %vm288_vm1, %v279_v35 }
 0x122   : > { %v308_v38 = vpop.f32.mrf.mxu0  ;;  %v321_v39 = vpop.f32.mrf.mxu1 }
 0x123   : > { %v325_v40 = vpack.c.bf16 %v308_v38, %v308_v38  ;;  %v326_v41 = vpack.c.bf16 %v321_v39, %v321_v39 }
 0x125   : > { %463 = vmatmul.bf16.vlgmr.msra.gmra.mxu2 %v325_v40  ;;  %476 = vmatmul.bf16.vlgmr.msra.gmra.mxu3 %v326_v41 }
 0x12a   : > { %v310_v42 = vpop.f32.mrf.mxu0  ;;  %v323_v43 = vpop.f32.mrf.mxu1 }
 0x1a8   : > { %v464_v44 = vpop.f32.mrf.mxu2  ;;  %v477_v45 = vpop.f32.mrf.mxu3 }
 0x1a9   : > { %v478_v46 = vadd.f32 %v477_v45, %v464_v44 }
 0x1ab   : > { %482 = vst.msk [vmem:[%s242_s11] sm:$0xff] %vm481_vm2, %v478_v46 }
 0x1ac   : > { %754 = shalt.err (!%p751_p5)
}
 0x1ad   : > { %669 = dma.vmem_to_hbm [thread:$0]  (%p879_p4), %s498_s12, 128, %s500_s13, %s484_s14  }
 0x1b0   : > { %v466_v47 = vpop.f32.mrf.mxu2  ;;  %v479_v48 = vpop.f32.mrf.mxu3 }
 0x1b1 PF: > { %p675_p6 = scmp.ge.s32.totalorder %s805_s23, 2  ;;  %s511_s27 = sand.u32 1, %s785_s18  }
 0x1b2   : > { %s512_s7 = scalar_lea.sflag [#allocation3], %s511_s27 }
 0x1b3   : > { %p672_p7 = pnand %p675_p6, %p886_p8 }
 0x1b5   : > { %p673_p9 = pneg %p672_p7 }
 0x1b7   : > { %780 = dma.done.wait (%p673_p9), %s512_s7, 128  }
 0x1b8   : > { %782 = vsyncadd (%p673_p9), %s512_s7, 4294967168  ;;  %s18_s23 = sadd.s32 1, %s805_s23   ;;  %s1001_s18 = smov %s789_s19 }
 0x1b9   : > { %p15_p10 = scmp.ge.s32.totalorder %s18_s23, 4   ;;  %s1002_s19 = smov %s793_s20 }
 0x1ba   : > { %s1003_s20 = smov %s892_s6  ;;  %s1004_s21 = smov %s801_s22 }
 0x1bb   : > { %s1005_s22 = smov %s1007_s26  ;;  %17 = sbr.rel (!%p15_p10) target bundleno = 4 (0x4), region = 75 }
 0x1c0   :  { %518 = vsyncpa [#allocation3], 1 }
 0x1c1   :  { %520 = vsyncpa [#allocation3 + $0x1], 1 }

</bundles_post_ra>
